<compile_context>
chip_gen: v7x
topology: tpu7x:2x2x1
jax: 0.10.0
libtpu: 0.0.40
codegen_flags: <defaults>
</compile_context>

<pallas_src>
import jax
import jax.numpy as jnp
from jax.experimental import pallas as pl
from jax.experimental.pallas import tpu as pltpu


# ----------------------------- configuration -----------------------------
class Cfg:
    use_meta = True
    embedding_size = 32     # cfg.embedding_size
    num_classes = 16        # cfg.num_classes


BACKBONE_OUT = 64           # self.backbone.out_features
K_SUB = 3                   # sub-centers in ArcMarginProduct_subcenter
NCLS = Cfg.num_classes
EMB = Cfg.embedding_size
BN_EPS = 1e-5
NORM_EPS = 1e-12            # F.normalize default eps

# Demo image geometry (small, consistent with a 3-channel image backbone).
C_IN = 3
H = 16
W = 16
HW = H * W
KK = 9 * C_IN               # im2col contraction dim (one K=27 MXU matmul)
# TODO(synk): at realistic resolutions, add an inner "arbitrary" spatial grid
# axis with a (TB, F) VMEM scratch pool accumulator and set vmem_limit_bytes;
# tile sizes must be re-derived for v7x's 64 MiB (32 MiB scoped) VMEM.


# ----------------------------- Pallas kernel -----------------------------
def _fused_kernel(cols_ref, meta_ref, w27_ref, bc_ref, pool_ref,
                  w1_ref, b1_ref, w2_ref, b2_ref, sf_ref, tf_ref,
                  prelu_ref, wa_ref, wm_ref, o_ref):
    """One grid step = TB images, fully fused backbone + head.

    cols_ref : (1, TB*HW, 27)  im2col rows (interior pixels only)
    meta_ref : (1, TB, 3E)     concatenated meta embeddings
    w27_ref  : (27, F)         conv weight, row index = tap*C_in + c
    bc_ref   : (1, F)          conv bias
    pool_ref : (TB, TB*HW)     block-diagonal 1/(H*W) average-pool matrix
    w1_ref/b1_ref/w2_ref/b2_ref : neck_meta Linears with eval-BN folded in
    sf_ref/tf_ref : (1, F)     eval-BN affine on the pooled image feature
    prelu_ref: (1, E)          PReLU slope (broadcast to E lanes)
    wa_ref   : (K, F, C)       ArcFace weights, image-feature half, L2-normed
    wm_ref   : (K, F, C)       ArcFace weights, meta-feature half, L2-normed
    o_ref    : (1, TB, C)      per-class cosine (max over sub-centers)
    """
    # conv3x3 + bias + ReLU as a single (TB*HW, 27) @ (27, F) MXU matmul.
    y = jnp.dot(cols_ref[0], w27_ref[...], preferred_element_type=jnp.float32)
    y = jnp.maximum(y + bc_ref[...], 0.0)                        # (TB*HW, F)

    # Global average pool on the MXU: (TB, TB*HW) @ (TB*HW, F).
    feat = jnp.dot(pool_ref[...], y, preferred_element_type=jnp.float32)
    f = feat * sf_ref[...] + tf_ref[...]                         # BN1d (eval)

    # neck_meta (eval-BN affines pre-folded into the Linear weights/biases).
    m = meta_ref[0]                                              # (TB, 3E)
    h = jnp.dot(m, w1_ref[...], preferred_element_type=jnp.float32) + b1_ref[...]
    h = jnp.maximum(h, 0.0) + prelu_ref[...] * jnp.minimum(h, 0.0)   # PReLU
    fm = jnp.dot(h, w2_ref[...], preferred_element_type=jnp.float32) + b2_ref[...]

    # ||concat(f, fm)||^2 = ||f||^2 + ||fm||^2  (concat never materialized).
    n2 = (jnp.sum(f * f, axis=-1, keepdims=True)
          + jnp.sum(fm * fm, axis=-1, keepdims=True))
    inv = 1.0 / jnp.maximum(jnp.sqrt(n2), NORM_EPS)
    fn = f * inv
    fmn = fm * inv

    # Sub-center ArcFace: K narrow dots + VPU max (no lane-offset slicing).
    cmax = (jnp.dot(fn, wa_ref[0], preferred_element_type=jnp.float32)
            + jnp.dot(fmn, wm_ref[0], preferred_element_type=jnp.float32))
    for j in range(1, K_SUB):
        cj = (jnp.dot(fn, wa_ref[j], preferred_element_type=jnp.float32)
              + jnp.dot(fmn, wm_ref[j], preferred_element_type=jnp.float32))
        cmax = jnp.maximum(cmax, cj)
    o_ref[0] = cmax


# ----------------------------- parameters / glue -----------------------------
def bn_affine(gamma, beta, mean, var):
    scale = gamma / jnp.sqrt(var + BN_EPS)
    shift = beta - mean * scale
    return scale, shift


def make_params(key):
    E, F_out, C = EMB, BACKBONE_OUT, NCLS
    ks = jax.random.split(key, 24)
    p = {}
    # TODO(synk): BackBone is undefined in the reference; use a minimal
    # synthetic backbone = Conv2d(3, F, 3, padding=1) + ReLU + global pool.
    p["conv_w"] = 0.1 * jax.random.normal(ks[0], (F_out, C_IN, 3, 3), jnp.float32)
    p["conv_b"] = 0.01 * jax.random.normal(ks[1], (F_out,), jnp.float32)
    # embeddings
    p["endemic_emb"] = jax.random.normal(ks[2], (2, E), jnp.float32)
    p["code_emb"] = jax.random.normal(ks[3], (207, E), jnp.float32)
    p["country_emb"] = jax.random.normal(ks[4], (2152, E), jnp.float32)
    # neck_meta
    p["w1"] = 0.1 * jax.random.normal(ks[5], (3 * E, E), jnp.float32)
    p["b1"] = 0.01 * jax.random.normal(ks[6], (E,), jnp.float32)
    p["bn1_gamma"] = 1.0 + 0.1 * jax.random.normal(ks[7], (E,), jnp.float32)
    p["bn1_beta"] = 0.1 * jax.random.normal(ks[8], (E,), jnp.float32)
    p["bn1_mean"] = 0.1 * jax.random.normal(ks[9], (E,), jnp.float32)
    p["bn1_var"] = 1.0 + 0.1 * jax.random.uniform(ks[10], (E,), jnp.float32)
    p["prelu_a"] = jnp.full((1,), 0.25, jnp.float32)   # nn.PReLU() parameter
    p["w2"] = 0.1 * jax.random.normal(ks[11], (E, F_out), jnp.float32)
    p["b2"] = 0.01 * jax.random.normal(ks[12], (F_out,), jnp.float32)
    p["bn2_gamma"] = 1.0 + 0.1 * jax.random.normal(ks[13], (F_out,), jnp.float32)
    p["bn2_beta"] = 0.1 * jax.random.normal(ks[14], (F_out,), jnp.float32)
    p["bn2_mean"] = 0.1 * jax.random.normal(ks[15], (F_out,), jnp.float32)
    p["bn2_var"] = 1.0 + 0.1 * jax.random.uniform(ks[16], (F_out,), jnp.float32)
    # self.bn on pooled backbone feature
    p["bnf_gamma"] = 1.0 + 0.1 * jax.random.normal(ks[17], (F_out,), jnp.float32)
    p["bnf_beta"] = 0.1 * jax.random.normal(ks[18], (F_out,), jnp.float32)
    p["bnf_mean"] = 0.1 * jax.random.normal(ks[19], (F_out,), jnp.float32)
    p["bnf_var"] = 1.0 + 0.1 * jax.random.uniform(ks[20], (F_out,), jnp.float32)
    # ArcHead_id_meta weight: (num_classes * K_SUB, 2 * F), class-major rows
    # (row = class * K + sub_center), matching cosine.view(-1, C, K).max(dim=2).
    p["arc_w"] = jax.random.normal(ks[21], (C * K_SUB, 2 * F_out), jnp.float32)
    return p


@jax.jit
def snake_net_teacher_forward(params, x, endemic, code, country):
    E, F_out, C = EMB, BACKBONE_OUT, NCLS
    N = x.shape[0]
    assert x.shape == (N, C_IN, H, W)

    # >=2 "parallel" grid steps when N is even: feeds both v7x TensorCores; on
    # single-TC v5e/v6e the extra step costs ~0.35us, negligible.
    num_tiles = 2 if (N >= 2 and N % 2 == 0) else 1
    TB = N // num_tiles

    # ---------------- host-side im2col (tiny; lane-dense K=27 rows) ----------
    x_nhwc = jnp.transpose(x, (0, 2, 3, 1))                       # (N,H,W,Cin)
    x_pad = jnp.pad(x_nhwc, ((0, 0), (1, 1), (1, 1), (0, 0)))     # (N,HP,WP,Cin)
    taps = [x_pad[:, dh:dh + H, dw:dw + W, :]
            for dh in range(3) for dw in range(3)]
    cols = jnp.stack(taps, axis=3).reshape(N, HW, KK)             # (N, HW, 27)
    cols = cols.reshape(num_tiles, TB * HW, KK)

    # conv weight: (F,Cin,3,3) -> (27, F) with row index = (dh*3+dw)*Cin + c
    w27 = jnp.transpose(params["conv_w"], (2, 3, 1, 0)).reshape(KK, F_out)
    bc = params["conv_b"].reshape(1, F_out)

    # block-diagonal average-pool matrix (identical for every tile)
    pool = jnp.repeat(jnp.eye(TB, dtype=jnp.float32), HW, axis=1) / float(HW)

    # ---------------- meta embeddings (tiny gathers, XLA glue) --------------
    e = jnp.take(params["endemic_emb"], endemic, axis=0)
    cf = jnp.take(params["code_emb"], code, axis=0)
    co = jnp.take(params["country_emb"], country, axis=0)
    meta = jnp.concatenate([e, cf, co], axis=-1).reshape(num_tiles, TB, 3 * E)

    # ---------------- fold eval-mode BN affines into the neck Linears -------
    s1, t1 = bn_affine(params["bn1_gamma"], params["bn1_beta"],
                       params["bn1_mean"], params["bn1_var"])
    s2, t2 = bn_affine(params["bn2_gamma"], params["bn2_beta"],
                       params["bn2_mean"], params["bn2_var"])
    w1f = params["w1"] * s1[None, :]
    b1f = (params["b1"] * s1 + t1).reshape(1, E)
    w2f = params["w2"] * s2[None, :]
    b2f = (params["b2"] * s2 + t2).reshape(1, F_out)
    sf, tf = bn_affine(params["bnf_gamma"], params["bnf_beta"],
                       params["bnf_mean"], params["bnf_var"])
    sf = sf.reshape(1, F_out)
    tf = tf.reshape(1, F_out)
    prelu = jnp.broadcast_to(params["prelu_a"].reshape(1, 1), (1, E))

    # -------- ArcFace sub-center weights: normalize / split / transpose -----
    aw = params["arc_w"]                                          # (C*K, 2F)
    wn = aw / jnp.maximum(
        jnp.sqrt(jnp.sum(aw * aw, axis=1, keepdims=True)), NORM_EPS)
    wn3 = wn.reshape(C, K_SUB, 2 * F_out)                         # [class, sub, feat]
    wa = jnp.transpose(wn3[:, :, :F_out], (1, 2, 0))              # (K, F, C) image half
    wm = jnp.transpose(wn3[:, :, F_out:], (1, 2, 0))              # (K, F, C) meta half

    def inv2(shape):
        return pl.BlockSpec(shape, lambda t: (0, 0))

    def inv3(shape):
        return pl.BlockSpec(shape, lambda t: (0, 0, 0))

    cos = pl.pallas_call(
        _fused_kernel,
        out_shape=jax.ShapeDtypeStruct((num_tiles, TB, C), jnp.float32),
        grid=(num_tiles,),
        in_specs=[
            pl.BlockSpec((1, TB * HW, KK), lambda t: (t, 0, 0)),  # im2col rows
            pl.BlockSpec((1, TB, 3 * E), lambda t: (t, 0, 0)),    # meta features
            inv2((KK, F_out)),                                    # conv weight
            inv2((1, F_out)),                                     # conv bias
            inv2((TB, TB * HW)),                                  # pool matrix
            inv2((3 * E, E)),                                     # w1 (BN folded)
            inv2((1, E)),                                         # b1
            inv2((E, F_out)),                                     # w2 (BN folded)
            inv2((1, F_out)),                                     # b2
            inv2((1, F_out)),                                     # bn scale
            inv2((1, F_out)),                                     # bn shift
            inv2((1, E)),                                         # PReLU slope
            inv3((K_SUB, F_out, C)),                              # arc W (img half)
            inv3((K_SUB, F_out, C)),                              # arc W (meta half)
        ],
        out_specs=pl.BlockSpec((1, TB, C), lambda t: (t, 0, 0)),
        compiler_params=pltpu.CompilerParams(
            dimension_semantics=("parallel",)),
    )(cols, meta, w27, bc, pool, w1f, b1f, w2f, b2f, sf, tf, prelu, wa, wm)

    return cos.reshape(N, C), None


# ----------------------------- demo -----------------------------
if __name__ == "__main__":
    key = jax.random.PRNGKey(0)
    kp, kx, ke, kc, kco = jax.random.split(key, 5)

    params = make_params(kp)
    x = jax.random.normal(kx, (2, C_IN, H, W), jnp.float32)       # NCHW
    endemic = jax.random.randint(ke, (2,), 0, 2)
    code = jax.random.randint(kc, (2,), 0, 207)
    country = jax.random.randint(kco, (2,), 0, 2152)

    cosine_id, aux = snake_net_teacher_forward(params, x, endemic, code, country)
    cosine_id = jax.block_until_ready(cosine_id)
    assert cosine_id.shape == (2, Cfg.num_classes)
    assert aux is None
    print("KERNEL_OK")
</pallas_src>

<mosaic_0001>
module attributes {stable_mosaic.version = 11 : i64} {
  func.func @_fused_kernel(%arg0: i32, %arg1: memref<1x256x27xf32, #tpu.memory_space<vmem>>, %arg2: memref<1x1x96xf32, #tpu.memory_space<vmem>>, %arg3: memref<27x64xf32, #tpu.memory_space<vmem>>, %arg4: memref<1x64xf32, #tpu.memory_space<vmem>>, %arg5: memref<1x256xf32, #tpu.memory_space<vmem>>, %arg6: memref<96x32xf32, #tpu.memory_space<vmem>>, %arg7: memref<1x32xf32, #tpu.memory_space<vmem>>, %arg8: memref<32x64xf32, #tpu.memory_space<vmem>>, %arg9: memref<1x64xf32, #tpu.memory_space<vmem>>, %arg10: memref<1x64xf32, #tpu.memory_space<vmem>>, %arg11: memref<1x64xf32, #tpu.memory_space<vmem>>, %arg12: memref<1x32xf32, #tpu.memory_space<vmem>>, %arg13: memref<3x64x16xf32, #tpu.memory_space<vmem>>, %arg14: memref<3x64x16xf32, #tpu.memory_space<vmem>>, %arg15: memref<1x1x16xf32, #tpu.memory_space<vmem>>) attributes {dimension_semantics = [#tpu.dimension_semantics<parallel>], iteration_bounds = array<i64: 2>, scalar_prefetch = 0 : i64, scratch_operands = 0 : i64, tpu.core_type = #tpu.core_type<tc>, window_params = [{transform_indices = @transform_0, window_bounds = array<i64: 1, 256, 27>}, {transform_indices = @transform_1, window_bounds = array<i64: 1, 1, 96>}, {pipeline_mode = #tpu.pipeline_mode<synchronous>, transform_indices = @transform_2, window_bounds = array<i64: 27, 64>}, {pipeline_mode = #tpu.pipeline_mode<synchronous>, transform_indices = @transform_3, window_bounds = array<i64: 1, 64>}, {pipeline_mode = #tpu.pipeline_mode<synchronous>, transform_indices = @transform_4, window_bounds = array<i64: 1, 256>}, {pipeline_mode = #tpu.pipeline_mode<synchronous>, transform_indices = @transform_5, window_bounds = array<i64: 96, 32>}, {pipeline_mode = #tpu.pipeline_mode<synchronous>, transform_indices = @transform_6, window_bounds = array<i64: 1, 32>}, {pipeline_mode = #tpu.pipeline_mode<synchronous>, transform_indices = @transform_7, window_bounds = array<i64: 32, 64>}, {pipeline_mode = #tpu.pipeline_mode<synchronous>, transform_indices = @transform_8, window_bounds = array<i64: 1, 64>}, {pipeline_mode = #tpu.pipeline_mode<synchronous>, transform_indices = @transform_9, window_bounds = array<i64: 1, 64>}, {pipeline_mode = #tpu.pipeline_mode<synchronous>, transform_indices = @transform_10, window_bounds = array<i64: 1, 64>}, {pipeline_mode = #tpu.pipeline_mode<synchronous>, transform_indices = @transform_11, window_bounds = array<i64: 1, 32>}, {pipeline_mode = #tpu.pipeline_mode<synchronous>, transform_indices = @transform_12, window_bounds = array<i64: 3, 64, 16>}, {pipeline_mode = #tpu.pipeline_mode<synchronous>, transform_indices = @transform_13, window_bounds = array<i64: 3, 64, 16>}, {transform_indices = @transform_14, window_bounds = array<i64: 1, 1, 16>}]} {
    %c0 = arith.constant 0 : index
    %c0_0 = arith.constant 0 : index
    %c0_1 = arith.constant 0 : index
    %0 = vector.load %arg1[%c0, %c0_0, %c0_1] : memref<1x256x27xf32, #tpu.memory_space<vmem>>, vector<1x256x27xf32>
    %1 = vector.shape_cast %0 : vector<1x256x27xf32> to vector<256x27xf32>
    %c0_2 = arith.constant 0 : index
    %c0_3 = arith.constant 0 : index
    %2 = vector.load %arg3[%c0_2, %c0_3] : memref<27x64xf32, #tpu.memory_space<vmem>>, vector<27x64xf32>
    %cst = arith.constant dense<0.000000e+00> : vector<256x64xf32>
    %3 = tpu.matmul %1, %2, %cst {dimension_numbers = #tpu.dot_dimension_numbers<[1], [0], [0], [1], [0, 0, 1, 1], [], []>} : vector<256x27xf32>, vector<27x64xf32>, vector<256x64xf32> -> vector<256x64xf32>
    %c0_4 = arith.constant 0 : index
    %c0_5 = arith.constant 0 : index
    %4 = vector.load %arg4[%c0_4, %c0_5] : memref<1x64xf32, #tpu.memory_space<vmem>>, vector<1x64xf32>
    %5 = vector.broadcast %4 : vector<1x64xf32> to vector<256x64xf32>
    %6 = arith.addf %3, %5 : vector<256x64xf32>
    %cst_6 = arith.constant 0.000000e+00 : f32
    %7 = vector.broadcast %cst_6 : f32 to vector<256x64xf32>
    %8 = arith.maximumf %6, %7 : vector<256x64xf32>
    %c0_7 = arith.constant 0 : index
    %c0_8 = arith.constant 0 : index
    %9 = vector.load %arg5[%c0_7, %c0_8] : memref<1x256xf32, #tpu.memory_space<vmem>>, vector<1x256xf32>
    %cst_9 = arith.constant dense<0.000000e+00> : vector<1x64xf32>
    %10 = tpu.matmul %9, %8, %cst_9 {dimension_numbers = #tpu.dot_dimension_numbers<[1], [0], [0], [1], [0, 0, 1, 1], [], []>} : vector<1x256xf32>, vector<256x64xf32>, vector<1x64xf32> -> vector<1x64xf32>
    %c0_10 = arith.constant 0 : index
    %c0_11 = arith.constant 0 : index
    %11 = vector.load %arg10[%c0_10, %c0_11] : memref<1x64xf32, #tpu.memory_space<vmem>>, vector<1x64xf32>
    %12 = arith.mulf %10, %11 : vector<1x64xf32>
    %c0_12 = arith.constant 0 : index
    %c0_13 = arith.constant 0 : index
    %13 = vector.load %arg11[%c0_12, %c0_13] : memref<1x64xf32, #tpu.memory_space<vmem>>, vector<1x64xf32>
    %14 = arith.addf %12, %13 : vector<1x64xf32>
    %c0_14 = arith.constant 0 : index
    %c0_15 = arith.constant 0 : index
    %c0_16 = arith.constant 0 : index
    %15 = vector.load %arg2[%c0_14, %c0_15, %c0_16] : memref<1x1x96xf32, #tpu.memory_space<vmem>>, vector<1x1x96xf32>
    %16 = vector.shape_cast %15 : vector<1x1x96xf32> to vector<1x96xf32>
    %c0_17 = arith.constant 0 : index
    %c0_18 = arith.constant 0 : index
    %17 = vector.load %arg6[%c0_17, %c0_18] : memref<96x32xf32, #tpu.memory_space<vmem>>, vector<96x32xf32>
    %cst_19 = arith.constant dense<0.000000e+00> : vector<1x32xf32>
    %18 = tpu.matmul %16, %17, %cst_19 {dimension_numbers = #tpu.dot_dimension_numbers<[1], [0], [0], [1], [0, 0, 1, 1], [], []>} : vector<1x96xf32>, vector<96x32xf32>, vector<1x32xf32> -> vector<1x32xf32>
    %c0_20 = arith.constant 0 : index
    %c0_21 = arith.constant 0 : index
    %19 = vector.load %arg7[%c0_20, %c0_21] : memref<1x32xf32, #tpu.memory_space<vmem>>, vector<1x32xf32>
    %20 = arith.addf %18, %19 : vector<1x32xf32>
    %cst_22 = arith.constant 0.000000e+00 : f32
    %21 = vector.broadcast %cst_22 : f32 to vector<1x32xf32>
    %22 = arith.maximumf %20, %21 : vector<1x32xf32>
    %c0_23 = arith.constant 0 : index
    %c0_24 = arith.constant 0 : index
    %23 = vector.load %arg12[%c0_23, %c0_24] : memref<1x32xf32, #tpu.memory_space<vmem>>, vector<1x32xf32>
    %cst_25 = arith.constant 0.000000e+00 : f32
    %24 = vector.broadcast %cst_25 : f32 to vector<1x32xf32>
    %25 = arith.minimumf %20, %24 : vector<1x32xf32>
    %26 = arith.mulf %23, %25 : vector<1x32xf32>
    %27 = arith.addf %22, %26 : vector<1x32xf32>
    %c0_26 = arith.constant 0 : index
    %c0_27 = arith.constant 0 : index
    %28 = vector.load %arg8[%c0_26, %c0_27] : memref<32x64xf32, #tpu.memory_space<vmem>>, vector<32x64xf32>
    %cst_28 = arith.constant dense<0.000000e+00> : vector<1x64xf32>
    %29 = tpu.matmul %27, %28, %cst_28 {dimension_numbers = #tpu.dot_dimension_numbers<[1], [0], [0], [1], [0, 0, 1, 1], [], []>} : vector<1x32xf32>, vector<32x64xf32>, vector<1x64xf32> -> vector<1x64xf32>
    %c0_29 = arith.constant 0 : index
    %c0_30 = arith.constant 0 : index
    %30 = vector.load %arg9[%c0_29, %c0_30] : memref<1x64xf32, #tpu.memory_space<vmem>>, vector<1x64xf32>
    %31 = arith.addf %29, %30 : vector<1x64xf32>
    %32 = arith.mulf %14, %14 : vector<1x64xf32>
    %cst_31 = arith.constant dense<0.000000e+00> : vector<1xf32>
    %33 = vector.multi_reduction <add>, %32, %cst_31 [1] : vector<1x64xf32> to vector<1xf32>
    %34 = vector.shape_cast %33 : vector<1xf32> to vector<1x1xf32>
    %35 = arith.mulf %31, %31 : vector<1x64xf32>
    %cst_32 = arith.constant dense<0.000000e+00> : vector<1xf32>
    %36 = vector.multi_reduction <add>, %35, %cst_32 [1] : vector<1x64xf32> to vector<1xf32>
    %37 = vector.shape_cast %36 : vector<1xf32> to vector<1x1xf32>
    %38 = arith.addf %34, %37 : vector<1x1xf32>
    %39 = math.sqrt %38 : vector<1x1xf32>
    %cst_33 = arith.constant 9.99999996E-13 : f32
    %40 = vector.broadcast %cst_33 : f32 to vector<1x1xf32>
    %41 = arith.maximumf %39, %40 : vector<1x1xf32>
    %cst_34 = arith.constant 1.000000e+00 : f32
    %42 = vector.broadcast %cst_34 : f32 to vector<1x1xf32>
    %43 = arith.divf %42, %41 : vector<1x1xf32>
    %44 = vector.broadcast %43 : vector<1x1xf32> to vector<1x64xf32>
    %45 = arith.mulf %14, %44 : vector<1x64xf32>
    %46 = vector.broadcast %43 : vector<1x1xf32> to vector<1x64xf32>
    %47 = arith.mulf %31, %46 : vector<1x64xf32>
    %c0_35 = arith.constant 0 : index
    %c0_36 = arith.constant 0 : index
    %c0_37 = arith.constant 0 : index
    %48 = vector.load %arg13[%c0_35, %c0_36, %c0_37] : memref<3x64x16xf32, #tpu.memory_space<vmem>>, vector<1x64x16xf32>
    %49 = vector.shape_cast %48 : vector<1x64x16xf32> to vector<64x16xf32>
    %cst_38 = arith.constant dense<0.000000e+00> : vector<1x16xf32>
    %50 = tpu.matmul %45, %49, %cst_38 {dimension_numbers = #tpu.dot_dimension_numbers<[1], [0], [0], [1], [0, 0, 1, 1], [], []>} : vector<1x64xf32>, vector<64x16xf32>, vector<1x16xf32> -> vector<1x16xf32>
    %c0_39 = arith.constant 0 : index
    %c0_40 = arith.constant 0 : index
    %c0_41 = arith.constant 0 : index
    %51 = vector.load %arg14[%c0_39, %c0_40, %c0_41] : memref<3x64x16xf32, #tpu.memory_space<vmem>>, vector<1x64x16xf32>
    %52 = vector.shape_cast %51 : vector<1x64x16xf32> to vector<64x16xf32>
    %cst_42 = arith.constant dense<0.000000e+00> : vector<1x16xf32>
    %53 = tpu.matmul %47, %52, %cst_42 {dimension_numbers = #tpu.dot_dimension_numbers<[1], [0], [0], [1], [0, 0, 1, 1], [], []>} : vector<1x64xf32>, vector<64x16xf32>, vector<1x16xf32> -> vector<1x16xf32>
    %54 = arith.addf %50, %53 : vector<1x16xf32>
    %c1 = arith.constant 1 : index
    %c0_43 = arith.constant 0 : index
    %c0_44 = arith.constant 0 : index
    %55 = vector.load %arg13[%c1, %c0_43, %c0_44] : memref<3x64x16xf32, #tpu.memory_space<vmem>>, vector<1x64x16xf32>
    %56 = vector.shape_cast %55 : vector<1x64x16xf32> to vector<64x16xf32>
    %cst_45 = arith.constant dense<0.000000e+00> : vector<1x16xf32>
    %57 = tpu.matmul %45, %56, %cst_45 {dimension_numbers = #tpu.dot_dimension_numbers<[1], [0], [0], [1], [0, 0, 1, 1], [], []>} : vector<1x64xf32>, vector<64x16xf32>, vector<1x16xf32> -> vector<1x16xf32>
    %c1_46 = arith.constant 1 : index
    %c0_47 = arith.constant 0 : index
    %c0_48 = arith.constant 0 : index
    %58 = vector.load %arg14[%c1_46, %c0_47, %c0_48] : memref<3x64x16xf32, #tpu.memory_space<vmem>>, vector<1x64x16xf32>
    %59 = vector.shape_cast %58 : vector<1x64x16xf32> to vector<64x16xf32>
    %cst_49 = arith.constant dense<0.000000e+00> : vector<1x16xf32>
    %60 = tpu.matmul %47, %59, %cst_49 {dimension_numbers = #tpu.dot_dimension_numbers<[1], [0], [0], [1], [0, 0, 1, 1], [], []>} : vector<1x64xf32>, vector<64x16xf32>, vector<1x16xf32> -> vector<1x16xf32>
    %61 = arith.addf %57, %60 : vector<1x16xf32>
    %62 = arith.maximumf %54, %61 : vector<1x16xf32>
    %c2 = arith.constant 2 : index
    %c0_50 = arith.constant 0 : index
    %c0_51 = arith.constant 0 : index
    %63 = vector.load %arg13[%c2, %c0_50, %c0_51] : memref<3x64x16xf32, #tpu.memory_space<vmem>>, vector<1x64x16xf32>
    %64 = vector.shape_cast %63 : vector<1x64x16xf32> to vector<64x16xf32>
    %cst_52 = arith.constant dense<0.000000e+00> : vector<1x16xf32>
    %65 = tpu.matmul %45, %64, %cst_52 {dimension_numbers = #tpu.dot_dimension_numbers<[1], [0], [0], [1], [0, 0, 1, 1], [], []>} : vector<1x64xf32>, vector<64x16xf32>, vector<1x16xf32> -> vector<1x16xf32>
    %c2_53 = arith.constant 2 : index
    %c0_54 = arith.constant 0 : index
    %c0_55 = arith.constant 0 : index
    %66 = vector.load %arg14[%c2_53, %c0_54, %c0_55] : memref<3x64x16xf32, #tpu.memory_space<vmem>>, vector<1x64x16xf32>
    %67 = vector.shape_cast %66 : vector<1x64x16xf32> to vector<64x16xf32>
    %cst_56 = arith.constant dense<0.000000e+00> : vector<1x16xf32>
    %68 = tpu.matmul %47, %67, %cst_56 {dimension_numbers = #tpu.dot_dimension_numbers<[1], [0], [0], [1], [0, 0, 1, 1], [], []>} : vector<1x64xf32>, vector<64x16xf32>, vector<1x16xf32> -> vector<1x16xf32>
    %69 = arith.addf %65, %68 : vector<1x16xf32>
    %70 = arith.maximumf %62, %69 : vector<1x16xf32>
    %c0_57 = arith.constant 0 : index
    %c0_58 = arith.constant 0 : index
    %c0_59 = arith.constant 0 : index
    %71 = vector.load %arg15[%c0_57, %c0_58, %c0_59] : memref<1x1x16xf32, #tpu.memory_space<vmem>>, vector<1x1x16xf32>
    %72 = vector.shape_cast %71 : vector<1x1x16xf32> to vector<1x16xf32>
    %73 = vector.shape_cast %70 : vector<1x16xf32> to vector<1x1x16xf32>
    tpu.vector_store %arg15[%c0_57, %c0_58, %c0_59], %73 {strides = array<i32>} : memref<1x1x16xf32, #tpu.memory_space<vmem>>, vector<1x1x16xf32>,
    return
  }
  func.func @transform_0(%arg0: i32) -> (i32, i32, i32) {
    %c0_i32 = arith.constant 0 : i32
    %c0_i32_0 = arith.constant 0 : i32
    %c0_i32_1 = arith.constant 0 : i32
    return %arg0, %c0_i32, %c0_i32_0 : i32, i32, i32
  }
  func.func @transform_1(%arg0: i32) -> (i32, i32, i32) {
    %c0_i32 = arith.constant 0 : i32
    %c0_i32_0 = arith.constant 0 : i32
    %c0_i32_1 = arith.constant 0 : i32
    return %arg0, %c0_i32, %c0_i32_0 : i32, i32, i32
  }
  func.func @transform_2(%arg0: i32) -> (i32, i32) {
    %c0_i32 = arith.constant 0 : i32
    %c0_i32_0 = arith.constant 0 : i32
    %c0_i32_1 = arith.constant 0 : i32
    return %c0_i32, %c0_i32_0 : i32, i32
  }
  func.func @transform_3(%arg0: i32) -> (i32, i32) {
    %c0_i32 = arith.constant 0 : i32
    %c0_i32_0 = arith.constant 0 : i32
    %c0_i32_1 = arith.constant 0 : i32
    return %c0_i32, %c0_i32_0 : i32, i32
  }
  func.func @transform_4(%arg0: i32) -> (i32, i32) {
    %c0_i32 = arith.constant 0 : i32
    %c0_i32_0 = arith.constant 0 : i32
    %c0_i32_1 = arith.constant 0 : i32
    return %c0_i32, %c0_i32_0 : i32, i32
  }
  func.func @transform_5(%arg0: i32) -> (i32, i32) {
    %c0_i32 = arith.constant 0 : i32
    %c0_i32_0 = arith.constant 0 : i32
    %c0_i32_1 = arith.constant 0 : i32
    return %c0_i32, %c0_i32_0 : i32, i32
  }
  func.func @transform_6(%arg0: i32) -> (i32, i32) {
    %c0_i32 = arith.constant 0 : i32
    %c0_i32_0 = arith.constant 0 : i32
    %c0_i32_1 = arith.constant 0 : i32
    return %c0_i32, %c0_i32_0 : i32, i32
  }
  func.func @transform_7(%arg0: i32) -> (i32, i32) {
    %c0_i32 = arith.constant 0 : i32
    %c0_i32_0 = arith.constant 0 : i32
    %c0_i32_1 = arith.constant 0 : i32
    return %c0_i32, %c0_i32_0 : i32, i32
  }
  func.func @transform_8(%arg0: i32) -> (i32, i32) {
    %c0_i32 = arith.constant 0 : i32
    %c0_i32_0 = arith.constant 0 : i32
    %c0_i32_1 = arith.constant 0 : i32
    return %c0_i32, %c0_i32_0 : i32, i32
  }
  func.func @transform_9(%arg0: i32) -> (i32, i32) {
    %c0_i32 = arith.constant 0 : i32
    %c0_i32_0 = arith.constant 0 : i32
    %c0_i32_1 = arith.constant 0 : i32
    return %c0_i32, %c0_i32_0 : i32, i32
  }
  func.func @transform_10(%arg0: i32) -> (i32, i32) {
    %c0_i32 = arith.constant 0 : i32
    %c0_i32_0 = arith.constant 0 : i32
    %c0_i32_1 = arith.constant 0 : i32
    return %c0_i32, %c0_i32_0 : i32, i32
  }
  func.func @transform_11(%arg0: i32) -> (i32, i32) {
    %c0_i32 = arith.constant 0 : i32
    %c0_i32_0 = arith.constant 0 : i32
    %c0_i32_1 = arith.constant 0 : i32
    return %c0_i32, %c0_i32_0 : i32, i32
  }
  func.func @transform_12(%arg0: i32) -> (i32, i32, i32) {
    %c0_i32 = arith.constant 0 : i32
    %c0_i32_0 = arith.constant 0 : i32
    %c0_i32_1 = arith.constant 0 : i32
    %c0_i32_2 = arith.constant 0 : i32
    return %c0_i32, %c0_i32_0, %c0_i32_1 : i32, i32, i32
  }
  func.func @transform_13(%arg0: i32) -> (i32, i32, i32) {
    %c0_i32 = arith.constant 0 : i32
    %c0_i32_0 = arith.constant 0 : i32
    %c0_i32_1 = arith.constant 0 : i32
    %c0_i32_2 = arith.constant 0 : i32
    return %c0_i32, %c0_i32_0, %c0_i32_1 : i32, i32, i32
  }
  func.func @transform_14(%arg0: i32) -> (i32, i32, i32) {
    %c0_i32 = arith.constant 0 : i32
    %c0_i32_0 = arith.constant 0 : i32
    %c0_i32_1 = arith.constant 0 : i32
    return %arg0, %c0_i32, %c0_i32_0 : i32, i32, i32
  }
}

</mosaic_0001>

<bundles_post_ra>
// kernel: div.8
= control target key start
LH: loop header
LB: loop body
LE: loop exit
PB: predicated region body
PF: predicated region fallthrough
CT: control target
= control target key end

     0   :  { %s26_s0 = inlined_call_operand.<no memory space> [shape: f32[], index: 0, kind: input, shape index: {}]   ;;  %s27_s1 = inlined_call_operand.vmem [shape: f32[1,256], index: 1, kind: output, shape index: {}]  }
   0x1   :  { %v2_v0 = vstv %s26_s0 }
   0x2   :  { %3 = vst [vmem:[%s27_s1] sm:$0x1] %v2_v0  ;;  %6 = vst [vmem:[%s27_s1 + $0x1] sm:$0x1] %v2_v0 }

// kernel: snake_net_teacher_forward.1
= control target key start
LH: loop header
LB: loop body
LE: loop exit
PB: predicated region body
PF: predicated region fallthrough
CT: control target
= control target key end

     0   :  { %s3011_s0 = inlined_call_operand.vmem [shape: f32[2,256,27], index: 0, kind: input, shape index: {}]   ;;  %s3012_s1 = inlined_call_operand.vmem [shape: f32[2,1,96], index: 1, kind: input, shape index: {}]   ;;  %s3013_s2 = inlined_call_operand.vmem [shape: f32[27,64], index: 2, kind: input, shape index: {}]   ;;  %s3014_s3 = inlined_call_operand.vmem [shape: f32[1,64], index: 3, kind: input, shape index: {}]   ;;  %s3015_s4 = inlined_call_operand.vmem [shape: f32[1,256], index: 4, kind: input, shape index: {}]   ;;  %s3016_s5 = inlined_call_operand.vmem [shape: f32[96,32], index: 5, kind: input, shape index: {}]   ;;  %s3017_s6 = inlined_call_operand.vmem [shape: f32[1,32], index: 6, kind: input, shape index: {}]   ;;  %s3018_s7 = inlined_call_operand.vmem [shape: f32[32,64], index: 7, kind: input, shape index: {}]   ;;  %s3019_s8 = inlined_call_operand.vmem [shape: f32[1,64], index: 8, kind: input, shape index: {}]   ;;  %s3020_s9 = inlined_call_operand.vmem [shape: f32[1,64], index: 9, kind: input, shape index: {}]   ;;  %s3021_s10 = inlined_call_operand.vmem [shape: f32[1,64], index: 10, kind: input, shape index: {}]   ;;  %s3022_s11 = inlined_call_operand.vmem [shape: f32[1,32], index: 11, kind: input, shape index: {}]   ;;  %s3023_s12 = inlined_call_operand.vmem [shape: f32[3,64,16], index: 12, kind: input, shape index: {}]   ;;  %s3024_s13 = inlined_call_operand.vmem [shape: f32[3,64,16], index: 13, kind: input, shape index: {}]   ;;  %s3025_s14 = inlined_call_operand.hbm [shape: f32[2,1,16], index: 14, kind: output, shape index: {}]  }
   0x1   :  { %3026 = sst [smem:[#allocation6_spill]] %s3011_s0 }
   0x2   :  { %3027 = sst [smem:[#allocation7_spill]] %s3012_s1 }
   0x3   :  { %3028 = sst [smem:[#allocation8_spill]] %s3013_s2 }
   0x4   :  { %19 = vsyncpa [#allocation3], 0 }
   0x5   :  { %21 = vsyncpa [#allocation3 + $0x1], 0  ;;  %s2489_s29 = smov 0   ;;  %s2491_s30 = smov 0  }
   0x6   :  { %s2493_s15 = smov 0   ;;  %s2495_s16 = smov 0  }
   0x7 LB: > { %s2510_s17 = sadd.s32 4294967295, %s2407_s16   ;;  %s1720_s18 = sadd.s32 4294967294, %s2407_s16   ;;  %s2407_s16 = sphi %s2495_s16, %s3039_s16   ;;  %s2403_s15 = sphi %s2493_s15, %s3038_s15   ;;  %s2399_s30 = sphi %s2491_s30, %s3037_s30   ;;  %s2395_s29 = sphi %s2489_s29, %s3036_s29  }
   0x8   : > { %s2514_s19 = sadd.s32 1, %s2407_s16   ;;  %s338_s20 = sadd.s32 1, %s2403_s15 }
   0x9   : > { %s335_s21 = ssub.s32 %s2407_s16, %s2514_s19  ;;  %p348_p0 = scmp.ne.s32.totalorder %s2403_s15, %s2399_s30 }
   0xa   : > { %p336_p1 = scmp.eq.s32.totalorder %s335_s21, 0  ;;  %p349_p2 = scmp.eq.s32.totalorder %s2510_s17, 1 }
   0xb   : > { %p354_p3 = scmp.ne.s32.totalorder %s2399_s30, %s2395_s29  ;;  %p355_p4 = scmp.eq.s32.totalorder %s1720_s18, 1 }
   0xc   : > { %s2525_s22 = scalar_select %p336_p1, %s2403_s15, %s338_s20  }
   0xd   : > { %p2527_p5 = por %p349_p2, %p348_p0  ;;  %p2531_p6 = por %p355_p4, %p354_p3 }
   0xe   : > { %3029 = sst [smem:[#allocation5_spill]] %s2525_s22  ;;  %p1723_p7 = scmp.ge.s32.totalorder %s2407_s16, 1 }
   0xf   : > { %p423_p8 = scmp.lt.s32.totalorder %s2407_s16, 3 }
  0x11   : > { %p424_p9 = pnand %p1723_p7, %p423_p8 }
  0x12   : > { %s3032_s2 = sld [smem:[#allocation8_spill]] (!%p424_p9)  ;;  %vm619_vm0 = vcmask (!%p424_p9), 1042432   ;;  %p471_p10 = scmp.lt.s32.totalorder (!%p424_p9), %s2510_s17, 1  ;;  %vm2409_vm1 = vmmov (!%p424_p9), 1   ;;  %vm522_vm3 = vcmask (!%p424_p9), 220160   ;;  %v882_v38 = vlaneseq (!%p424_p9) }
  0x13   : > { %427 = sbr.rel (%p424_p9) target bundleno = 1215 (0x4bf), region = 76  ;;  %vm2160_vm2 = vmpackc.low (!%p424_p9), %vm619_vm0, %vm2409_vm1  ;;  %s3033_s0 = sld [smem:[#allocation6_spill]] (!%p424_p9)  ;;  %v880_v41 = vld [vmem:[%s3015_s4] sm:$0x3] (!%p424_p9)  ;;  %v2410_v45 = vmov (!%p424_p9), 0.0|0.0   ;;  %vm2411_vm4 = vmmov (!%p424_p9), 0  }
  0x14   : > { %v883_v39 = vshrl.u32 (!%p424_p9), %v882_v38, 7  ;;  %v2412_v46 = vmov (!%p424_p9), 0.0   ;;  %v2634_v47 = vld [vmem:[%s3014_s3] ss:$0 sm:$0xff] (!%p424_p9)  ;;  %s3034_s1 = sld [smem:[#allocation7_spill]] (!%p424_p9)  ;;  %vm980_vm5 = vcmask (!%p424_p9), 785408  }
  0x15   : > { %vm1139_vm6 = vcmask (!%p424_p9), 516096   ;;  %vm1064_vm7 = vcmask (!%p424_p9), 261120   ;;  %vm1176_vm10 = vcmask (!%p424_p9), 523264   ;;  %s469_s28 = sand.u32 (!%p424_p9), 1, %s2399_s30   ;;  %vm1641_vm11 = vcmask (!%p424_p9), 122880  }
  0x16   : > { %v888_v40 = vsub.s32 (!%p424_p9), 1, %v883_v39  ;;  %v884_v42 = vsub.s32 (!%p424_p9), 0, %v883_v39  ;;  %s470_s22 = scalar_lea.vmem (!%p424_p9), [#allocation2], %s469_s28 }
  0x18   : > { %v511_v0 = vld [vmem:[%s3032_s2] sm:$0xff] (!%p424_p9)  ;;  %v512_v1 = vld [vmem:[%s3032_s2 + $0x8] sm:$0xff] (!%p424_p9)  ;;  %v513_v2 = vld [vmem:[%s3032_s2 + $0x10] sm:$0xff] (!%p424_p9)  ;;  %v889_v43 = vrot.slane (!%p424_p9), %v880_v41, %v888_v40  ;;  %v2626_v44 = vrot.slane (!%p424_p9), %v880_v41, %v884_v42 }
  0x19   : > { %v2155_v3 = vpack.c.bf16 (!%p424_p9), %v512_v1, %v511_v0  ;;  %v514_v4 = vld [vmem:[%s3032_s2 + $0x18] sm:$0x7] (!%p424_p9) }
  0x1a   : > { %v2159_v5 = vpack.c.bf16 %v514_v4, %v513_v2  ;;  %s2551_s25 = scalar_select %p471_p10, %s2510_s17, 1  ;;  %956 = vmatprep.mubr.f32.mxu1 %v889_v43 }
  0x1b   : > { %2156 = vmatprep.subr.bf16.mxu0 %v2155_v3 }
  0x1c   : > { %2158 = vmatpush3.bf16.msra.mxu0 %v2155_v3  ;;  %s1803_s26 = sshll.u32 %s2551_s25, 8 }
  0x1d   : > { %2161 = vmatprep.subr.msk.bf16.mxu0 %vm2160_vm2, %v2159_v5  ;;  %s2557_s18 = scalar_lea.vmem %s3033_s0, %s1803_s26  ;;  %s2413_s26 = smov [#allocation2]  }
  0x1e   : > { %v479_v6 = vld [vmem:[%s2557_s18] sm:$0xff]  ;;  %v480_v7 = vld [vmem:[%s2557_s18 + $0x8] sm:$0xff]  ;;  %v481_v8 = vld [vmem:[%s2557_s18 + $0x10] sm:$0xff]  ;;  %s2349_s27 = sshll.u32 %s2413_s26, 4  ;;  %s2350_s27 = int_to_ptr.vmem [resolvable:$false] %s2349_s27 }
  0x1f   : > { %1955 = vmatprep.mubr.msk.f32.mxu0 %vm522_vm3, %v479_v6  ;;  %v482_v9 = vld [vmem:[%s2557_s18 + $0x18] sm:$0xff]  ;;  %v483_v10 = vld [vmem:[%s2557_s18 + $0x20] sm:$0xff]  ;;  %v484_v11 = vld [vmem:[%s2557_s18 + $0x28] sm:$0xff]  ;;  %s2351_s2 = scalar_lea.vmem %s2350_s27, 32 }
  0x20   : > { %2164 = vmatpush3.bf16.msk.msra.mxu0 %vm2160_vm2, %v2159_v5  ;;  %v485_v12 = vld [vmem:[%s2557_s18 + $0x30] sm:$0xff]  ;;  %v486_v13 = vld [vmem:[%s2557_s18 + $0x38] sm:$0xff]  ;;  %v487_v14 = vld [vmem:[%s2557_s18 + $0x40] sm:$0xff] }
  0x21   : > { %v488_v15 = vld [vmem:[%s2557_s18 + $0x48] sm:$0xff]  ;;  %v489_v16 = vld [vmem:[%s2557_s18 + $0x50] sm:$0xff]  ;;  %v490_v17 = vld [vmem:[%s2557_s18 + $0x58] sm:$0xff]  ;;  %2233 = vmatprep.subr.bf16.mxu0 %v2410_v45 }
  0x22   : > { %v491_v18 = vld [vmem:[%s2557_s18 + $0x60] sm:$0xff]  ;;  %v492_v19 = vld [vmem:[%s2557_s18 + $0x68] sm:$0xff]  ;;  %v493_v20 = vld [vmem:[%s2557_s18 + $0x70] sm:$0xff] }
  0x23   : > { %1956 = vmatmul.mubr.msk.f32.vlgmr.msra.gmra.mrb[0].mxu0 %vm522_vm3, %v480_v7  ;;  %v494_v21 = vld [vmem:[%s2557_s18 + $0x78] sm:$0xff]  ;;  %v495_v22 = vld [vmem:[%s2557_s18 + $0x80] sm:$0xff]  ;;  %v496_v23 = vld [vmem:[%s2557_s18 + $0x88] sm:$0xff] }
  0x24   : > { %1958 = vmatprep.mubr.msk.f32.mxu0 %vm522_vm3, %v481_v8  ;;  %v497_v24 = vld [vmem:[%s2557_s18 + $0x90] sm:$0xff]  ;;  %v498_v25 = vld [vmem:[%s2557_s18 + $0x98] sm:$0xff]  ;;  %v499_v26 = vld [vmem:[%s2557_s18 + $0xa0] sm:$0xff] }
  0x25   : > { %v500_v27 = vld [vmem:[%s2557_s18 + $0xa8] sm:$0xff]  ;;  %v501_v28 = vld [vmem:[%s2557_s18 + $0xb0] sm:$0xff]  ;;  %v502_v29 = vld [vmem:[%s2557_s18 + $0xb8] sm:$0xff] }
  0x26   : > { %v503_v30 = vld [vmem:[%s2557_s18 + $0xc0] sm:$0xff]  ;;  %v504_v31 = vld [vmem:[%s2557_s18 + $0xc8] sm:$0xff]  ;;  %v505_v32 = vld [vmem:[%s2557_s18 + $0xd0] sm:$0xff] }
  0x27   : > { %1959 = vmatmul.mubr.msk.f32.gmra.mrb[2].mxu0 %vm522_vm3, %v482_v9  ;;  %v506_v33 = vld [vmem:[%s2557_s18 + $0xd8] sm:$0xff]  ;;  %v507_v34 = vld [vmem:[%s2557_s18 + $0xe0] sm:$0xff]  ;;  %v508_v35 = vld [vmem:[%s2557_s18 + $0xe8] sm:$0xff] }
  0x28   : > { %1961 = vmatprep.mubr.msk.f32.mxu0 %vm522_vm3, %v483_v10  ;;  %v509_v36 = vld [vmem:[%s2557_s18 + $0xf0] sm:$0xff]  ;;  %v510_v37 = vld [vmem:[%s2557_s18 + $0xf8] sm:$0xff]  ;;  %s478_s18 = scalar_lea.vmem %s3034_s1, %s2551_s25  ;;  %s1656_s1 = sshll.u32 %s470_s22, 4  ;;  %s2971_s1 = int_to_ptr.vmem [resolvable:$true] %s1656_s1 }
  0x29   : > { %s1644_s25 = scalar_lea.sflag [#allocation3], %s469_s28  ;;  %p2352_p0 = scmp.lt.s32.totalorder %s2971_s1, %s2350_s27 }
  0x2b   : > { %1962 = vmatmul.mubr.msk.f32.gmra.mrb[4].mxu0 %vm522_vm3, %v484_v11 }
  0x2c   : > { %1964 = vmatprep.mubr.msk.f32.mxu0 %vm522_vm3, %v485_v12 }
  0x2f   : > { %1965 = vmatmul.mubr.msk.f32.gmra.mrb[6].mxu0 %vm522_vm3, %v486_v13 }
  0x30   : > { %1967 = vmatprep.mubr.msk.f32.mxu0 %vm522_vm3, %v487_v14 }
  0x33   : > { %1968 = vmatmul.mubr.msk.f32.gmra.mrb[8].mxu0 %vm522_vm3, %v488_v15 }
  0x34   : > { %1970 = vmatprep.mubr.msk.f32.mxu0 %vm522_vm3, %v489_v16 }
  0x37   : > { %1971 = vmatmul.mubr.msk.f32.gmra.mrb[10].mxu0 %vm522_vm3, %v490_v17 }
  0x38   : > { %1973 = vmatprep.mubr.msk.f32.mxu0 %vm522_vm3, %v491_v18 }
  0x3b   : > { %1974 = vmatmul.mubr.msk.f32.gmra.mrb[12].mxu0 %vm522_vm3, %v492_v19 }
  0x3c   : > { %1976 = vmatprep.mubr.msk.f32.mxu0 %vm522_vm3, %v493_v20 }
  0x3f   : > { %1977 = vmatmul.mubr.msk.f32.gmra.mrb[14].mxu0 %vm522_vm3, %v494_v21 }
  0x40   : > { %1979 = vmatprep.mubr.msk.f32.mxu0 %vm522_vm3, %v495_v22 }
  0x43   : > { %1980 = vmatmul.mubr.msk.f32.gmra.mrb[16].mxu0 %vm522_vm3, %v496_v23 }
  0x44   : > { %1982 = vmatprep.mubr.msk.f32.mxu0 %vm522_vm3, %v497_v24 }
  0x47   : > { %1983 = vmatmul.mubr.msk.f32.gmra.mrb[18].mxu0 %vm522_vm3, %v498_v25 }
  0x48   : > { %1985 = vmatprep.mubr.msk.f32.mxu0 %vm522_vm3, %v499_v26 }
  0x4b   : > { %1986 = vmatmul.mubr.msk.f32.gmra.mrb[20].mxu0 %vm522_vm3, %v500_v27 }
  0x4c   : > { %1988 = vmatprep.mubr.msk.f32.mxu0 %vm522_vm3, %v501_v28 }
  0x4f   : > { %1989 = vmatmul.mubr.msk.f32.gmra.mrb[22].mxu0 %vm522_vm3, %v502_v29 }
  0x50   : > { %1991 = vmatprep.mubr.msk.f32.mxu0 %vm522_vm3, %v503_v30 }
  0x53   : > { %1992 = vmatmul.mubr.msk.f32.gmra.mrb[24].mxu0 %vm522_vm3, %v504_v31 }
  0x54   : > { %1994 = vmatprep.mubr.msk.f32.mxu0 %vm522_vm3, %v505_v32 }
  0x57   : > { %1995 = vmatmul.mubr.msk.f32.gmra.mrb[26].mxu0 %vm522_vm3, %v506_v33 }
  0x58   : > { %1997 = vmatprep.mubr.msk.f32.mxu0 %vm522_vm3, %v507_v34 }
  0x5b   : > { %1998 = vmatmul.mubr.msk.f32.gmra.mrb[28].mxu0 %vm522_vm3, %v508_v35 }
  0x5c   : > { %2000 = vmatprep.mubr.msk.f32.mxu0 %vm522_vm3, %v509_v36 }
  0x5f   : > { %2001 = vmatmul.mubr.msk.f32.gmra.mrb[30].mxu0 %vm522_vm3, %v510_v37 }
  0x60   : > { %2076 = vmatprep.mubr.msk.f32.mxu0 %vm2411_vm4, %v2412_v46 }
  0xf6   : > { %v1957_v48 = vpop.f32.mrb[0].mxu0 }
  0xf7   : > { %v695_v49 = vadd.f32 %v1957_v48, %v2634_v47  ;;  %v689_v50 = vpop.f32.mrb[1].mxu0 }
  0xf8   : > { %v690_v51 = vadd.f32 %v2634_v47, %v689_v50 }
  0xf9   : > { %v849_v52 = vmax.f32 %v695_v49, 0.0 }
  0xfa   : > { %v848_v53 = vmax.f32 %v690_v51, 0.0  ;;  %v1960_v54 = vpop.f32.mrb[2].mxu0 }
  0xfb   : > { %v705_v55 = vadd.f32 %v1960_v54, %v2634_v47  ;;  %v699_v56 = vpop.f32.mrb[3].mxu0 }
  0xfc   : > { %v700_v57 = vadd.f32 %v2634_v47, %v699_v56  ;;  %v2167_v58 = vpack.c.bf16 %v849_v52, %v848_v53 }
  0xfd   : > { %v851_v59 = vmax.f32 %v705_v55, 0.0 }
  0xfe   : > { %v850_v60 = vmax.f32 %v700_v57, 0.0  ;;  %v1963_v61 = vpop.f32.mrb[4].mxu0 }
  0xff   : > { %v715_v62 = vadd.f32 %v1963_v61, %v2634_v47  ;;  %v709_v63 = vpop.f32.mrb[5].mxu0 }
 0x100   : > { %v2641_v0 = vpack.c.bf16 %v851_v59, %v850_v60  ;;  %v710_v1 = vadd.f32 %v2634_v47, %v709_v63 }
 0x101   : > { %v853_v2 = vmax.f32 %v715_v62, 0.0 }
 0x102   : > { %v852_v3 = vmax.f32 %v710_v1, 0.0  ;;  %v1966_v4 = vpop.f32.mrb[6].mxu0 }
 0x103   : > { %v725_v5 = vadd.f32 %v1966_v4, %v2634_v47  ;;  %v719_v6 = vpop.f32.mrb[7].mxu0 }
 0x104   : > { %v2645_v7 = vpack.c.bf16 %v853_v2, %v852_v3  ;;  %v720_v8 = vadd.f32 %v2634_v47, %v719_v6 }
 0x105   : > { %v855_v9 = vmax.f32 %v725_v5, 0.0 }
 0x106   : > { %v854_v10 = vmax.f32 %v720_v8, 0.0  ;;  %v1969_v11 = vpop.f32.mrb[8].mxu0 }
 0x107   : > { %v735_v12 = vadd.f32 %v1969_v11, %v2634_v47  ;;  %v729_v13 = vpop.f32.mrb[9].mxu0 }
 0x108   : > { %v2649_v14 = vpack.c.bf16 %v855_v9, %v854_v10  ;;  %v730_v15 = vadd.f32 %v2634_v47, %v729_v13 }
 0x109   : > { %v857_v16 = vmax.f32 %v735_v12, 0.0 }
 0x10a   : > { %v856_v17 = vmax.f32 %v730_v15, 0.0  ;;  %v1972_v18 = vpop.f32.mrb[10].mxu0 }
 0x10b   : > { %v745_v19 = vadd.f32 %v1972_v18, %v2634_v47  ;;  %v739_v20 = vpop.f32.mrb[11].mxu0 }
 0x10c   : > { %v2653_v21 = vpack.c.bf16 %v857_v16, %v856_v17  ;;  %v740_v22 = vadd.f32 %v2634_v47, %v739_v20 }
 0x10d   : > { %v859_v23 = vmax.f32 %v745_v19, 0.0 }
 0x10e   : > { %v858_v24 = vmax.f32 %v740_v22, 0.0  ;;  %v1975_v25 = vpop.f32.mrb[12].mxu0 }
 0x10f   : > { %v755_v26 = vadd.f32 %v1975_v25, %v2634_v47  ;;  %v749_v27 = vpop.f32.mrb[13].mxu0 }
 0x110   : > { %v2657_v28 = vpack.c.bf16 %v859_v23, %v858_v24  ;;  %v750_v29 = vadd.f32 %v2634_v47, %v749_v27 }
 0x111   : > { %v861_v30 = vmax.f32 %v755_v26, 0.0 }
 0x112   : > { %v860_v31 = vmax.f32 %v750_v29, 0.0  ;;  %v1978_v32 = vpop.f32.mrb[14].mxu0 }
 0x113   : > { %v765_v33 = vadd.f32 %v1978_v32, %v2634_v47  ;;  %v759_v34 = vpop.f32.mrb[15].mxu0 }
 0x114   : > { %v2661_v35 = vpack.c.bf16 %v861_v30, %v860_v31  ;;  %v760_v36 = vadd.f32 %v2634_v47, %v759_v34 }
 0x115   : > { %v863_v37 = vmax.f32 %v765_v33, 0.0 }
 0x116   : > { %v862_v38 = vmax.f32 %v760_v36, 0.0  ;;  %v1981_v39 = vpop.f32.mrb[16].mxu0 }
 0x117   : > { %v775_v40 = vadd.f32 %v1981_v39, %v2634_v47  ;;  %v769_v41 = vpop.f32.mrb[17].mxu0  ;;  %v968_v39 = vld [vmem:[%s3016_s5 + $0x8] sm:$0xff] }
 0x118   : > { %v2665_v42 = vpack.c.bf16 %v863_v37, %v862_v38  ;;  %v770_v43 = vadd.f32 %v2634_v47, %v769_v41  ;;  %v967_v38 = vld [vmem:[%s3016_s5] sm:$0xff] }
 0x119   : > { %v865_v48 = vmax.f32 %v775_v40, 0.0  ;;  %v971_v41 = vld [vmem:[%s3016_s5 + $0x20] sm:$0xff] }
 0x11a   : > { %v864_v49 = vmax.f32 %v770_v43, 0.0  ;;  %v1984_v50 = vpop.f32.mrb[18].mxu0 }
 0x11b   : > { %v785_v51 = vadd.f32 %v1984_v50, %v2634_v47  ;;  %v779_v52 = vpop.f32.mrb[19].mxu0  ;;  %v975_v50 = vld [vmem:[%s3016_s5 + $0x40] sm:$0xff] }
 0x11c   : > { %v780_v53 = vadd.f32 %v2634_v47, %v779_v52  ;;  %v2165_v54 = vpack.c.bf16 %v865_v48, %v864_v49  ;;  %v974_v48 = vld [vmem:[%s3016_s5 + $0x38] sm:$0xff] }
 0x11d   : > { %v867_v55 = vmax.f32 %v785_v51, 0.0  ;;  %v976_v51 = vld [vmem:[%s3016_s5 + $0x48] sm:$0xff] }
 0x11e   : > { %v866_v56 = vmax.f32 %v780_v53, 0.0  ;;  %v1987_v57 = vpop.f32.mrb[20].mxu0  ;;  %2166 = vmatprep.subr.bf16.mxu1 %v2165_v54  ;;  %v2210_v52 = vpack.c.bf16 %v976_v51, %v975_v50  ;;  %v977_v53 = vld [vmem:[%s3016_s5 + $0x50] sm:$0xff]  ;;  %v978_v54 = vld [vmem:[%s3016_s5 + $0x58] sm:$0xff] }
 0x11f   : > { %v795_v59 = vadd.f32 %v1987_v57, %v2634_v47  ;;  %v789_v60 = vpop.f32.mrb[21].mxu0  ;;  %2168 = vmatpush3.bf16.msra.mxu1 %v2167_v58  ;;  %v1059_v57 = vld [vmem:[%s3018_s7] sm:$0xff] }
 0x120   : > { %v2169_v61 = vpack.c.bf16 %v867_v55, %v866_v56  ;;  %v790_v62 = vadd.f32 %v2634_v47, %v789_v60  ;;  %v2213_v55 = vpack.c.bf16 %v978_v54, %v977_v53  ;;  %v966_v56 = vld [vmem:[%s478_s18] sm:$0x1]  ;;  %s1800_s18 = sshll.u32 %s2510_s17, 4  ;;  %s2345_s17 = scalar_lea.vmem %s2971_s1, 16 }
 0x121   : > { %v869_v63 = vmax.f32 %v795_v59, 0.0  ;;  %v1060_v59 = vld [vmem:[%s3018_s7 + $0x8] sm:$0xff]  ;;  %s2969_s21 = scalar_lea.hbm %s3025_s14, %s1800_s18  ;;  %p2346_p11 = scmp.ne.s32.totalorder %s2971_s1, %s2345_s17 }
 0x122   : > { %v868_v1 = vmax.f32 %v790_v62, 0.0  ;;  %v1990_v2 = vpop.f32.mrb[22].mxu0  ;;  %2170 = vmatprep.subr.bf16.mxu1 %v2169_v61  ;;  %v2216_v60 = vpack.c.bf16 %v1060_v59, %v1059_v57  ;;  %v1061_v61 = vld [vmem:[%s3018_s7 + $0x10] sm:$0xff]  ;;  %v1062_v62 = vld [vmem:[%s3018_s7 + $0x18] sm:$0xff]  ;;  %v1772_v59 = vld [vmem:[%s3024_s13 + $0x40] sm:$0xff]  ;;  %p2353_p1 = scmp.lt.s32.totalorder %s2351_s2, %s2345_s17 }
 0x123   : > { %v805_v3 = vadd.f32 %v1990_v2, %v2634_v47  ;;  %v799_v4 = vpop.f32.mrb[23].mxu0  ;;  %2172 = vmatpush3.bf16.msra.mxu1 %v2641_v0  ;;  %p2347_p12 = pnand %p2346_p11, %p2527_p5 }
 0x124   : > { %v2173_v5 = vpack.c.bf16 %v869_v63, %v868_v1  ;;  %v800_v6 = vadd.f32 %v2634_v47, %v799_v4  ;;  %v2219_v63 = vpack.c.bf16 %v1062_v62, %v1061_v61  ;;  %v1790_v61 = vld [vmem:[%s3024_s13 + $0x80] sm:$0xff]  ;;  %v1791_v62 = vld [vmem:[%s3024_s13 + $0x88] sm:$0xff]  ;;  %p2354_p2 = por %p2353_p1, %p2352_p0 }
 0x125   : > { %v871_v8 = vmax.f32 %v805_v3, 0.0  ;;  %v962_v3 = vld [vmem:[%s3020_s9] sm:$0x1]  ;;  %p2348_p13 = pneg %p2347_p12 }
 0x126   : > { %v870_v9 = vmax.f32 %v800_v6, 0.0  ;;  %v1993_v10 = vpop.f32.mrb[24].mxu0  ;;  %2174 = vmatprep.subr.bf16.mxu1 %v2173_v5  ;;  %v964_v5 = vld [vmem:[%s3021_s10] sm:$0x1] }
 0x127   : > { %v815_v58 = vadd.f32 %v1993_v10, %v2634_v47  ;;  %v809_v11 = vpop.f32.mrb[25].mxu0  ;;  %2176 = vmatpush3.bf16.msra.mxu1 %v2645_v7  ;;  %p2355_p3 = pnand %p2354_p2, %p2348_p13 }
 0x128   : > { %v2177_v12 = vpack.c.bf16 %v871_v8, %v870_v9  ;;  %v810_v13 = vadd.f32 %v2634_v47, %v809_v11 }
 0x129   : > { %v873_v15 = vmax.f32 %v815_v58, 0.0  ;;  %v979_v58 = vld [vmem:[%s3017_s6] sm:$0x1] }
 0x12a   : > { %v872_v16 = vmax.f32 %v810_v13, 0.0  ;;  %v1996_v17 = vpop.f32.mrb[26].mxu0  ;;  %2178 = vmatprep.subr.bf16.mxu1 %v2177_v12 }
 0x12b   : > { %v825_v0 = vadd.f32 %v1996_v17, %v2634_v47  ;;  %v819_v18 = vpop.f32.mrb[27].mxu0  ;;  %2180 = vmatpush3.bf16.msra.mxu1 %v2649_v14 }
 0x12c   : > { %v2181_v19 = vpack.c.bf16 %v873_v15, %v872_v16  ;;  %v820_v20 = vadd.f32 %v2634_v47, %v819_v18  ;;  %v1055_v15 = vld [vmem:[%s3022_s11] sm:$0x1] }
 0x12d   : > { %v875_v22 = vmax.f32 %v825_v0, 0.0 }
 0x12e   : > { %v874_v23 = vmax.f32 %v820_v20, 0.0  ;;  %v1999_v24 = vpop.f32.mrb[28].mxu0  ;;  %2182 = vmatprep.subr.bf16.mxu1 %v2181_v19  ;;  %v1160_v19 = vld [vmem:[%s3023_s12] sm:$0xff]  ;;  %v1161_v20 = vld [vmem:[%s3023_s12 + $0x8] sm:$0xff] }
 0x12f   : > { %v835_v7 = vadd.f32 %v1999_v24, %v2634_v47  ;;  %v829_v25 = vpop.f32.mrb[29].mxu0  ;;  %2184 = vmatpush3.bf16.msra.mxu1 %v2653_v21  ;;  %v1163_v24 = vld [vmem:[%s3023_s12 + $0x18] sm:$0xff] }
 0x130   : > { %v2185_v26 = vpack.c.bf16 %v875_v22, %v874_v23  ;;  %v830_v27 = vadd.f32 %v2634_v47, %v829_v25  ;;  %v1162_v22 = vld [vmem:[%s3023_s12 + $0x10] sm:$0xff]  ;;  %v2234_v23 = vpack.c.bf16 %v1161_v20, %v1160_v19  ;;  %v1063_v25 = vld [vmem:[%s3019_s8] sm:$0x1]  ;;  %v1797_v20 = vld [vmem:[%s3024_s13 + $0xb8] sm:$0xff] }
 0x131   : > { %v877_v29 = vmax.f32 %v835_v7, 0.0  ;;  %v2237_v7 = vpack.c.bf16 %v1163_v24, %v1162_v22  ;;  %v1796_v19 = vld [vmem:[%s3024_s13 + $0xb0] sm:$0xff]  ;;  %v1764_v24 = vld [vmem:[%s3023_s12 + $0x40] sm:$0xff] }
 0x132   : > { %v876_v30 = vmax.f32 %v830_v27, 0.0  ;;  %v2002_v31 = vpop.f32.mrb[30].mxu0  ;;  %2186 = vmatprep.subr.bf16.mxu1 %v2185_v26  ;;  %2235 = vmatpush3.bf16.msra.mxu0 %v2234_v23  ;;  %v2279_v23 = vpack.c.bf16 %v1797_v20, %v1796_v19 }
 0x133   : > { %v845_v14 = vadd.f32 %v2002_v31, %v2634_v47  ;;  %v839_v32 = vpop.f32.mrb[31].mxu0  ;;  %2188 = vmatpush3.bf16.msra.mxu1 %v2657_v28  ;;  %v2198_v28 = vpack.c.bf16 %v968_v39, %v967_v38  ;;  %2236 = vmatprep.subr.bf16.mxu0 %v2410_v45  ;;  %v1165_v38 = vld [vmem:[%s3023_s12 + $0x28] sm:$0xff]  ;;  %v1166_v39 = vld [vmem:[%s3023_s12 + $0x30] sm:$0xff] }
 0x134   : > { %v2189_v33 = vpack.c.bf16 %v877_v29, %v876_v30  ;;  %v840_v34 = vadd.f32 %v2634_v47, %v839_v32  ;;  %v969_v47 = vld [vmem:[%s3016_s5 + $0x10] sm:$0xff]  ;;  %v1169_v32 = vld [vmem:[%s3024_s13 + $0x8] sm:$0xff] }
 0x135   : > { %v879_v36 = vmax.f32 %v845_v14, 0.0  ;;  %v1168_v14 = vld [vmem:[%s3024_s13] sm:$0xff] }
 0x136   : > { %v878_v37 = vmax.f32 %v840_v34, 0.0  ;;  %2190 = vmatprep.subr.bf16.mxu1 %v2189_v33  ;;  %2238 = vmatpush3.bf16.msra.mxu0 %v2237_v7  ;;  %v2222_v33 = vpack.c.bf16 %v1169_v32, %v1168_v14  ;;  %v1170_v34 = vld [vmem:[%s3024_s13 + $0x10] sm:$0xff]  ;;  %v1765_v7 = vld [vmem:[%s3023_s12 + $0x48] sm:$0xff]  ;;  %v1785_v32 = vld [vmem:[%s3023_s12 + $0x98] sm:$0xff] }
 0x137   : > { %2192 = vmatpush3.bf16.msra.mxu1 %v2661_v35  ;;  %v970_v35 = vld [vmem:[%s3016_s5 + $0x18] sm:$0xff]  ;;  %2239 = vmatprep.subr.bf16.mxu0 %v2410_v45  ;;  %v1784_v14 = vld [vmem:[%s3023_s12 + $0x90] sm:$0xff] }
 0x138   : > { %v2193_v21 = vpack.c.bf16 %v879_v36, %v878_v37  ;;  %v2201_v40 = vpack.c.bf16 %v970_v35, %v969_v47  ;;  %v1171_v36 = vld [vmem:[%s3024_s13 + $0x18] sm:$0xff]  ;;  %v1172_v35 = vld [vmem:[%s3024_s13 + $0x20] sm:$0xff] }
 0x139   : > { %v2225_v37 = vpack.c.bf16 %v1171_v36, %v1170_v34  ;;  %v1167_v47 = vld [vmem:[%s3023_s12 + $0x38] sm:$0xff]  ;;  %v2285_v34 = vpack.c.bf16 %v1785_v32, %v1784_v14  ;;  %v1768_v36 = vld [vmem:[%s3023_s12 + $0x60] sm:$0xff] }
 0x13a   : > { %2194 = vmatprep.subr.bf16.mxu1 %v2193_v21  ;;  %v1164_v21 = vld [vmem:[%s3023_s12 + $0x20] sm:$0xff] }
 0x13b   : > { %2196 = vmatpush3.bf16.msra.mxu1 %v2665_v42  ;;  %v972_v42 = vld [vmem:[%s3016_s5 + $0x28] sm:$0xff] }
 0x13c   : > { %2197 = vmatprep.subr.bf16.mxu1 %v2410_v45  ;;  %v2204_v43 = vpack.c.bf16 %v972_v42, %v971_v41  ;;  %v1174_v42 = vld [vmem:[%s3024_s13 + $0x30] sm:$0xff] }
 0x13e   : > { %957 = vmatmul.mubr.f32.vlgmr.msra.gmra.mrb[0].mxu1 %v2626_v44  ;;  %v973_v44 = vld [vmem:[%s3016_s5 + $0x30] sm:$0xff] }
 0x13f   : > { %2199 = vmatpush3.bf16.msra.mxu1 %v2198_v28  ;;  %2027 = vmatprep.mubr.msk.f32.mxu1 %vm2411_vm4, %v2412_v46  ;;  %v2207_v49 = vpack.c.bf16 %v974_v48, %v973_v44  ;;  %v2240_v28 = vpack.c.bf16 %v1165_v38, %v1164_v21  ;;  %v2243_v44 = vpack.c.bf16 %v1167_v47, %v1166_v39  ;;  %v1786_v21 = vld [vmem:[%s3023_s12 + $0xa0] sm:$0xff]  ;;  %v1787_v38 = vld [vmem:[%s3023_s12 + $0xa8] sm:$0xff]  ;;  %v1770_v47 = vld [vmem:[%s3023_s12 + $0x70] sm:$0xff] }
 0x140   : > { %2200 = vmatprep.subr.bf16.mxu1 %v2410_v45 }
 0x141   : > { %2241 = vmatpush3.bf16.msra.mxu0 %v2240_v28  ;;  %v2288_v28 = vpack.c.bf16 %v1787_v38, %v1786_v21 }
 0x142   : > { %2242 = vmatprep.subr.bf16.mxu0 %v2410_v45 }
 0x143   : > { %2202 = vmatpush3.bf16.msra.mxu1 %v2201_v40  ;;  %v1173_v40 = vld [vmem:[%s3024_s13 + $0x28] sm:$0xff] }
 0x144   : > { %2203 = vmatprep.subr.bf16.mxu1 %v2410_v45  ;;  %v2228_v41 = vpack.c.bf16 %v1173_v40, %v1172_v35  ;;  %v1771_v35 = vld [vmem:[%s3023_s12 + $0x78] sm:$0xff] }
 0x145   : > { %2244 = vmatpush3.bf16.msra.mxu0 %v2243_v44  ;;  %v1789_v40 = vld [vmem:[%s3023_s12 + $0xb8] sm:$0xff] }
 0x146   : > { %2269 = vmatprep.subr.bf16.mxu0 %v2410_v45 }
 0x147   : > { %2205 = vmatpush3.bf16.msra.mxu1 %v2204_v43  ;;  %v1175_v43 = vld [vmem:[%s3024_s13 + $0x38] sm:$0xff] }
 0x148   : > { %2206 = vmatprep.subr.bf16.mxu1 %v2410_v45  ;;  %v2231_v48 = vpack.c.bf16 %v1175_v43, %v1174_v42 }
 0x14b   : > { %2208 = vmatpush3.bf16.msra.mxu1 %v2207_v49 }
 0x14c   : > { %2209 = vmatprep.subr.bf16.mxu1 %v2410_v45 }
 0x14f   : > { %2211 = vmatpush3.bf16.msra.mxu1 %v2210_v52 }
 0x150   : > { %2212 = vmatprep.subr.bf16.mxu1 %v2410_v45 }
 0x153   : > { %2214 = vmatpush3.bf16.msra.mxu1 %v2213_v55 }
 0x154   : > { %2215 = vmatprep.subr.bf16.mxu1 %v2410_v45 }
 0x156   : > { %2028 = vmatmul.mubr.msk.f32.vlgmr.msra.gmra.mrb[2].mxu1 %vm980_vm5, %v966_v56 }
 0x157   : > { %2038 = vmatprep.mubr.msk.f32.mxu1 %vm2411_vm4, %v2412_v46  ;;  %2217 = vmatpush3.bf16.msra.mxu1 %v2216_v60  ;;  %v1773_v60 = vld [vmem:[%s3024_s13 + $0x48] sm:$0xff] }
 0x158   : > { %2218 = vmatprep.subr.bf16.mxu1 %v2410_v45 }
 0x15b   : > { %2220 = vmatpush3.bf16.msra.mxu1 %v2219_v63 }
 0x15c   : > { %2221 = vmatprep.subr.bf16.mxu1 %v2410_v45 }
 0x211   : > { %v1872_v1 = vpop.f32.mrb[0].mxu1 }
 0x212   : > { %v1873_v2 = vpop.f32.mrb[1].mxu1 }
 0x213   : > { %v1874_v4 = vadd.f32 %v1873_v2, %v1872_v1  ;;  %v2246_v1 = vpack.c.bf16 %v1773_v60, %v1772_v59  ;;  %v2270_v2 = vpack.c.bf16 %v1791_v62, %v1790_v61 }
 0x215   : > { %v963_v6 = vmul.f32 %v1874_v4, %v962_v3  ;;  %v1774_v3 = vld [vmem:[%s3024_s13 + $0x50] sm:$0xff] }
 0x217   : > { %v2761_v8 = vadd.f32 %v964_v5, %v963_v6  ;;  %v1775_v6 = vld [vmem:[%s3024_s13 + $0x58] sm:$0xff] }
 0x219   : > { %v1138_v9 = vmul.f32 %v2761_v8, %v2761_v8 }
 0x21b   : > { %v1140_v10 = vsel %vm1139_vm6, %v1138_v9, 0.0  ;;  %v1792_v9 = vld [vmem:[%s3024_s13 + $0x90] sm:$0xff] }
 0x21c   : > { %1141 = vadd.xlane.f32.xlu0 %v1140_v10  ;;  %v1793_v10 = vld [vmem:[%s3024_s13 + $0x98] sm:$0xff] }
 0x229   : > { %v1050_v11 = vpop.f32.mrb[2].mxu1 }
 0x22a   : > { %v1051_v12 = vadd.f32 %v1050_v11, %v979_v58  ;;  %v2029_v13 = vpop.f32.mrb[3].mxu1  ;;  %v2273_v58 = vpack.c.bf16 %v1793_v10, %v1792_v9  ;;  %v1776_v11 = vld [vmem:[%s3024_s13 + $0x60] sm:$0xff] }
 0x22b   : > { %v1794_v13 = vld [vmem:[%s3024_s13 + $0xa0] sm:$0xff] }
 0x22c   : > { %v1056_v16 = vmin.f32 %v1051_v12, 0.0  ;;  %v1054_v17 = vmax.f32 %v1051_v12, 0.0  ;;  %v1777_v12 = vld [vmem:[%s3024_s13 + $0x68] sm:$0xff] }
 0x22e   : > { %v1057_v0 = vmul.f32 %v1056_v16, %v1055_v15  ;;  %v1795_v15 = vld [vmem:[%s3024_s13 + $0xa8] sm:$0xff]  ;;  %v2252_v16 = vpack.c.bf16 %v1777_v12, %v1776_v11 }
 0x230   : > { %v1058_v18 = vadd.f32 %v1057_v0, %v1054_v17  ;;  %v2276_v17 = vpack.c.bf16 %v1795_v15, %v1794_v13  ;;  %v1778_v0 = vld [vmem:[%s3024_s13 + $0x70] sm:$0xff] }
 0x232   : > { %2039 = vmatmul.mubr.msk.f32.vlgmr.msra.gmra.mrb[4].mxu1 %vm1064_vm7, %v1058_v18  ;;  %v1779_v18 = vld [vmem:[%s3024_s13 + $0x78] sm:$0xff] }
 0x233   : > { %2057 = vmatprep.mubr.msk.f32.mxu1 %vm2411_vm4, %v2412_v46  ;;  %2223 = vmatpush3.bf16.msra.mxu1 %v2222_v33  ;;  %v2255_v22 = vpack.c.bf16 %v1779_v18, %v1778_v0 }
 0x234   : > { %2224 = vmatprep.subr.bf16.mxu1 %v2410_v45 }
 0x237   : > { %2226 = vmatpush3.bf16.msra.mxu1 %v2225_v37  ;;  %v1769_v37 = vld [vmem:[%s3023_s12 + $0x68] sm:$0xff] }
 0x238   : > { %2227 = vmatprep.subr.bf16.mxu1 %v2410_v45  ;;  %v2264_v39 = vpack.c.bf16 %v1769_v37, %v1768_v36 }
 0x23b   : > { %2229 = vmatpush3.bf16.msra.mxu1 %v2228_v41  ;;  %v2267_v41 = vpack.c.bf16 %v1771_v35, %v1770_v47 }
 0x23c   : > { %2230 = vmatprep.subr.bf16.mxu1 %v2410_v45 }
 0x23f   : > { %2232 = vmatpush3.bf16.msra.mxu1 %v2231_v48 }
 0x240   : > { %2245 = vmatprep.subr.bf16.mxu1 %v2410_v45 }
 0x2a9   : > { %v1142_v49 = vpop.xlane.xlu0 %1141 }
 0x305   : > { %v1134_v26 = vpop.f32.mrb[4].mxu1 }
 0x306   : > { %v1135_v27 = vadd.f32 %v1134_v26, %v1063_v25  ;;  %v2040_v29 = vpop.f32.mrb[5].mxu1  ;;  %v1782_v25 = vld [vmem:[%s3023_s12 + $0x80] sm:$0xff]  ;;  %v1783_v26 = vld [vmem:[%s3023_s12 + $0x88] sm:$0xff] }
 0x307   : > { %v2282_v29 = vpack.c.bf16 %v1783_v26, %v1782_v25 }
 0x308   : > { %v1143_v30 = vmul.f32 %v1135_v27, %v1135_v27 }
 0x30a   : > { %v1144_v31 = vsel %vm1139_vm6, %v1143_v30, 0.0  ;;  %v1766_v30 = vld [vmem:[%s3023_s12 + $0x50] sm:$0xff] }
 0x30b   : > { %1145 = vadd.xlane.f32.xlu0 %v1144_v31  ;;  %v1767_v31 = vld [vmem:[%s3023_s12 + $0x58] sm:$0xff] }
 0x30c   : > { %v2261_v33 = vpack.c.bf16 %v1767_v31, %v1766_v30 }
 0x398   : > { %v1146_v50 = vpop.xlane.xlu0 %1145 }
 0x399   : > { %v1147_v51 = vadd.f32 %v1146_v50, %v1142_v49 }
 0x39b   : > { %2341 = vrsqrt.f32 %v1147_v51  ;;  %vm1150_vm8 = vcmp.eq.f32.partialorder %v1147_v51, inf  ;;  %v1153_v54 = vand.u32 2147483648, %v1147_v51  ;;  %vm1152_vm9 = vcmp.eq.f32.partialorder %v1147_v51, 0.0 }
 0x3a5   : > { %v2342_v52 = vpop.eup %2341 }
 0x3a6   : > { %v1149_v53 = vmul.f32 %v2342_v52, %v1147_v51 }
 0x3a8   : > { %v1151_v55 = vsel %vm1150_vm8, %v1147_v51, %v1149_v53 }
 0x3a9   : > { %v1154_v56 = vsel %vm1152_vm9, %v1153_v54, %v1151_v55 }
 0x3aa   : > { %v1155_v57 = vmax.f32 %v1154_v56, 1e-12 }
 0x3ac   : > { %2343 = vrcp.f32 %v1155_v57 }
 0x3b6   : > { %v2344_v63 = vpop.eup %2343 }
 0x3b7   : > { %v1159_v4 = vmul.f32 %v2344_v63, %v1135_v27  ;;  %v2850_v5 = vmul.f32 %v2344_v63, %v2761_v8  ;;  %v2249_v8 = vpack.c.bf16 %v1775_v6, %v1774_v3  ;;  %v2258_v27 = vpack.c.bf16 %v1765_v7, %v1764_v24 }
 0x3b9   : > { %2058 = vmatmul.mubr.msk.f32.vlgmr.msra.gmra.mrb[6].mxu1 %vm1176_vm10, %v1159_v4  ;;  %2077 = vmatmul.mubr.msk.f32.vlgmr.msra.gmra.mrb[32].mxu0 %vm1176_vm10, %v2850_v5 }
 0x3ba   : > { %2247 = vmatpush3.bf16.msra.mxu1 %v2246_v1  ;;  %2271 = vmatpush3.bf16.msra.mxu0 %v2270_v2 }
 0x3bb   : > { %2248 = vmatprep.subr.bf16.mxu1 %v2410_v45  ;;  %2272 = vmatprep.subr.bf16.mxu0 %v2410_v45 }
 0x3bc   : > { %2095 = vmatprep.mubr.msk.f32.mxu1 %vm2411_vm4, %v2412_v46  ;;  %2133 = vmatprep.mubr.msk.f32.mxu0 %vm2411_vm4, %v2412_v46 }
 0x3be   : > { %2250 = vmatpush3.bf16.msra.mxu1 %v2249_v8  ;;  %2274 = vmatpush3.bf16.msra.mxu0 %v2273_v58 }
 0x3bf   : > { %2251 = vmatprep.subr.bf16.mxu1 %v2410_v45  ;;  %2275 = vmatprep.subr.bf16.mxu0 %v2410_v45 }
 0x3c2   : > { %2253 = vmatpush3.bf16.msra.mxu1 %v2252_v16  ;;  %2277 = vmatpush3.bf16.msra.mxu0 %v2276_v17 }
 0x3c3   : > { %2254 = vmatprep.subr.bf16.mxu1 %v2410_v45  ;;  %2278 = vmatprep.subr.bf16.mxu0 %v2410_v45 }
 0x3c6   : > { %2256 = vmatpush3.bf16.msra.mxu1 %v2255_v22  ;;  %2280 = vmatpush3.bf16.msra.mxu0 %v2279_v23 }
 0x3c7   : > { %2257 = vmatprep.subr.bf16.mxu1 %v2410_v45  ;;  %2281 = vmatprep.subr.bf16.mxu0 %v2410_v45 }
 0x3c9   : > { %2096 = vmatmul.mubr.msk.f32.vlgmr.msra.gmra.mrb[8].mxu1 %vm1176_vm10, %v1159_v4  ;;  %2134 = vmatmul.mubr.msk.f32.vlgmr.msra.gmra.mrb[34].mxu0 %vm1176_vm10, %v1159_v4 }
 0x3ca   : > { %2259 = vmatpush3.bf16.msra.mxu1 %v2258_v27  ;;  %2283 = vmatpush3.bf16.msra.mxu0 %v2282_v29 }
 0x3cb   : > { %2260 = vmatprep.subr.bf16.mxu1 %v2410_v45  ;;  %2284 = vmatprep.subr.bf16.mxu0 %v2410_v45 }
 0x3cc   : > { %2114 = vmatprep.mubr.msk.f32.mxu1 %vm2411_vm4, %v2412_v46  ;;  %2152 = vmatprep.mubr.msk.f32.mxu0 %vm2411_vm4, %v2412_v46  ;;  %v1788_v46 = vld [vmem:[%s3023_s12 + $0xb0] sm:$0xff] }
 0x3cd   : > { %v2291_v42 = vpack.c.bf16 %v1789_v40, %v1788_v46 }
 0x3ce   : > { %2262 = vmatpush3.bf16.msra.mxu1 %v2261_v33  ;;  %2286 = vmatpush3.bf16.msra.mxu0 %v2285_v34 }
 0x3cf   : > { %2263 = vmatprep.subr.bf16.mxu1 %v2410_v45  ;;  %2287 = vmatprep.subr.bf16.mxu0 %v2410_v45 }
 0x3d2   : > { %2265 = vmatpush3.bf16.msra.mxu1 %v2264_v39  ;;  %2289 = vmatpush3.bf16.msra.mxu0 %v2288_v28 }
 0x3d3   : > { %2266 = vmatprep.subr.bf16.mxu1 %v2410_v45  ;;  %2290 = vmatprep.subr.bf16.mxu0 %v2410_v45 }
 0x3d6   : > { %2268 = vmatpush3.bf16.msra.mxu1 %v2267_v41  ;;  %2292 = vmatpush3.bf16.msra.mxu0 %v2291_v42 }
 0x3d9   : > { %2115 = vmatmul.mubr.msk.f32.vlgmr.msra.gmra.mrb[8].mxu1 %vm1176_vm10, %v2850_v5  ;;  %2153 = vmatmul.mubr.msk.f32.vlgmr.msra.gmra.mrb[34].mxu0 %vm1176_vm10, %v2850_v5 }
 0x48c   : > { %v1246_v43 = vpop.f32.mrb[6].mxu1  ;;  %v1319_v44 = vpop.f32.mrb[32].mxu0 }
 0x48d   : > { %v1320_v48 = vadd.f32 %v1319_v44, %v1246_v43  ;;  %v2059_v49 = vpop.f32.mrb[7].mxu1  ;;  %v2078_v50 = vpop.f32.mrb[33].mxu0 }
 0x4ac   : > { %v1477_v51 = vpop.f32.mrb[8].mxu1  ;;  %v1636_v52 = vpop.f32.mrb[34].mxu0 }
 0x4ad   : > { %v1481_v45 = vmax.f32 %v1320_v48, %v1477_v51  ;;  %v2116_v53 = vpop.f32.mrb[9].mxu1  ;;  %v2154_v54 = vpop.f32.mrb[35].mxu0 }
 0x4af   : > { %v1640_v55 = vmax.f32 %v1481_v45, %v1636_v52 }
 0x4b1   : > { %1642 = vst.msk [vmem:[%s470_s22] sm:$0x1] %vm1641_vm11, %v1640_v55 }
 0x4b2   : > { %2358 = shalt.err (!%p2355_p3)
}
 0x4b3   : > { %s2359_s28 = scalar_lea.hbm %s2969_s21, 16  ;;  %s2363_s0 = scalar_lea.hbm %s3025_s14, 32 }
 0x4b4   : > { %p2360_p4 = scmp.ne.s32.totalorder %s2969_s21, %s2359_s28  ;;  %p2364_p9 = scmp.lt.u32.totalorder %s2969_s21, %s3025_s14 }
 0x4b5   : > { %p2365_p10 = scmp.lt.u32.totalorder %s2363_s0, %s2359_s28  ;;  %p2367_p12 = scmp.lt.u32.totalorder %s2359_s28, %s2969_s21 }
 0x4b6   : > { %p2361_p7 = pnand %p2360_p4, %p2527_p5 }
 0x4b7   : > { %p2366_p11 = por %p2365_p10, %p2364_p9 }
 0x4b8   : > { %p2362_p8 = pneg %p2361_p7 }
 0x4b9   : > { %p2368_p13 = por %p2367_p12, %p2366_p11 }
 0x4bb   : > { %p2369_p0 = pnand %p2368_p13, %p2362_p8 }
 0x4bd   : > { %2372 = shalt.err (!%p2369_p0)
}
 0x4be   : > { %2298 = dma.vmem_to_hbm [thread:$0]  (%p2527_p5), %s2971_s1, 16, %s2969_s21, %s1644_s25  }
 0x4bf PF: > { %p2304_p1 = scmp.ge.s32.totalorder %s2407_s16, 2  ;;  %s1668_s2 = sand.u32 1, %s2395_s29  }
 0x4c0   : > { %s1669_s17 = scalar_lea.sflag [#allocation3], %s1668_s2 }
 0x4c1   : > { %p2301_p2 = pnand %p2304_p1, %p2531_p6 }
 0x4c3   : > { %2390 = dma.done.wait (!%p2301_p2), %s1669_s17, 16  }
 0x4c4   : > { %2392 = vsyncadd (!%p2301_p2), %s1669_s17, 4294967280  ;;  %s3035_s27 = sld [smem:[#allocation5_spill]]  ;;  %p24_p3 = scmp.ge.s32.totalorder %s2514_s19, 4  }
 0x4c5   : > { %s3036_s29 = smov %s2399_s30  ;;  %s3037_s30 = smov %s2403_s15 }
 0x4c6   : > { %s3039_s16 = smov %s2514_s19  ;;  %26 = sbr.rel (!%p24_p3) target bundleno = 7 (0x7), region = 118 }
 0x4ca   : > { %s3038_s15 = smov %s3035_s27 }
 0x4cd   :  { %1673 = vsyncpa [#allocation3], 1 }
 0x4ce   :  { %1675 = vsyncpa [#allocation3 + $0x1], 1 }

</bundles_post_ra>
